<compile_context>
chip_gen: v7x
topology: tpu7x:2x2x1
jax: 0.10.0
libtpu: 0.0.40
codegen_flags: <defaults>
</compile_context>

<pallas_src>
import functools

import numpy as np

import jax
import jax.numpy as jnp
from jax.experimental import pallas as pl
from jax.experimental.pallas import tpu as pltpu


def _transition_kernel(x_ref, scale_ref, bias_ref, pool_ref, w_ref, o_ref, *,
                       ew_dtype):
    """One (batch, row-band) grid step.

    x_ref:     (1, Cin, tS)    f32   NCHW tile, tS = th*W (flattened row band)
    scale_ref: (Cin, 1)        f32   folded BN scale (broadcast along lanes)
    bias_ref:  (Cin, 1)        f32   folded BN bias
    pool_ref:  (tS, tS//4)     bf16  0/1 2x2-pool positions (0.25 folded into w)
    w_ref:     (Cout, Cin)     bf16  1x1 conv weight * 0.25
    o_ref:     (1, Cout, tS//4) out  flattened-NCHW output tile (lane-dense)
    """
    # BN (folded) + ReLU; per-channel broadcast along the lane (spatial) dim.
    # Runs in bf16 on v6e/v7x (packed VALU), f32 on v5e.
    a = x_ref[0].astype(ew_dtype)                                  # (Cin, tS)
    y = jnp.maximum(a * scale_ref[...].astype(ew_dtype)
                    + bias_ref[...].astype(ew_dtype), 0)

    # 2x2 average pool as a standard MXU matmul with a tile-local 0/1 matrix
    # (identical for every row band).  bf16 operands, f32 accumulate.
    yp = jnp.dot(y.astype(pool_ref.dtype), pool_ref[...],
                 preferred_element_type=jnp.float32)               # (Cin, tSp)

    # 1x1 conv (0.25 pool scale already folded into w): (Cout,Cin)@(Cin,tSp).
    z = jnp.dot(w_ref[...], yp.astype(w_ref.dtype),
                preferred_element_type=jnp.float32)                # (Cout, tSp)

    o_ref[0] = z.astype(o_ref.dtype)                               # bf16 store


def _device_kind():
    try:
        return jax.devices()[0].device_kind.lower()
    except Exception:  # pragma: no cover
        return ""


def _pick_row_tile(h, w, cin, budget_bytes):
    """Largest even th | H with th*W % 512 == 0 (input band and pooled band
    both multiples of 128 lanes -> legal tiled blocks, unmasked stores) whose
    f32 band fits the generation-aware budget and which yields >=2 bands.
    Falls back to the full-spatial block (always a legal full-dim block)."""
    best = h
    for th in range(2, h, 2):
        if h % th:
            continue
        if (th * w) % 512:
            continue
        if th * w * cin * 4 > budget_bytes:
            continue
        best = th
    return best


def transition_forward(x_nchw, gamma, beta, run_mean, run_var, conv_w,
                       *, eps=1e-5, droprate=0.0,
                       out_dtype=jnp.bfloat16, bf16_elementwise=None):
    """Eval-mode forward of `Transition`: avg_pool2d(conv1x1(relu(bn(x))), 2).

    Consumes the NCHW f32 input in place (no transpose / cast HBM pass);
    returns (N, Cout, H/2, W/2) in `out_dtype` (bf16 by default).
    """
    # TODO(synk): `arg.dropout` is undefined in the reference module; dropout
    # is treated as rate 0 / eval mode, i.e. identity.
    del droprate

    n, cin, h, w = x_nchw.shape
    cout = conv_w.shape[0]
    assert h % 2 == 0 and w % 2 == 0, "avg_pool2d(2) path assumes even H, W"
    hp, wp = h // 2, w // 2

    kind = _device_kind()
    if bf16_elementwise is None:
        # bf16 VALU exists on v6e/v7x; keep f32 elementwise on v5e and older.
        bf16_elementwise = not any(t in kind for t in ("v2", "v3", "v4", "v5"))
    ew_dtype = jnp.bfloat16 if bf16_elementwise else jnp.float32

    # Fold BatchNorm (eval mode, running stats) into per-channel scale/bias,
    # laid out (Cin, 1) so the kernel broadcasts along the lane (spatial) dim.
    scale = gamma / jnp.sqrt(run_var + eps)
    bias = beta - run_mean * scale
    scale_c = scale.astype(jnp.float32).reshape(cin, 1)
    bias_c = bias.astype(jnp.float32).reshape(cin, 1)

    # 1x1 conv weight with the avg-pool 1/4 folded in (exact).
    wgt = (conv_w.reshape(cout, cin) * 0.25).astype(jnp.bfloat16)

    # FREE reshapes only: NCHW -> (N, Cin, H*W); output -> (N, Cout, Hp, Wp).
    x_flat = x_nchw.reshape(n, cin, h * w)

    # Generation-aware row-band budget (v7x: 64 MiB VMEM/TC -> smaller bands).
    budget = (2 << 20) if ("v7" in kind or "tpu7" in kind) else (6 << 20)
    th = _pick_row_tile(h, w, cin, budget)
    ts, tsp = th * w, (th // 2) * wp
    n_bands = h // th

    # Tile-local 2x2-pool matrix (same for every band since th is even and
    # divides H): P[s, ph*Wp+pw] = 1 iff s == (2ph+dh)*W + (2pw+dw).
    s = np.arange(ts)
    cols = (s // w // 2) * wp + (s % w) // 2
    pool_np = np.zeros((ts, tsp), np.float32)
    pool_np[s, cols] = 1.0
    pool_mat = jnp.asarray(pool_np, dtype=jnp.bfloat16)

    out_bytes = np.dtype(out_dtype).itemsize
    ew_bytes = np.dtype(ew_dtype).itemsize

    # Explicit scoped-VMEM cap: double-buffered blocks + in-kernel temps,
    # 1.5x headroom, clamped to [16 MiB, 48 MiB] (safe on v7x's 64 MiB part).
    x_blk = cin * ts * 4
    o_blk = cout * tsp * out_bytes
    const_blk = ts * tsp * 2 + cout * cin * 2 + 2 * cin * 128 * 4
    temps = cin * ts * (ew_bytes + 2) + cin * tsp * 6 + cout * tsp * 4
    vmem_limit = int(min(48 << 20,
                         max(16 << 20,
                             int(1.5 * (2 * (x_blk + o_blk + const_blk)
                                        + temps)))))

    cost = pl.CostEstimate(
        flops=(2 * n * n_bands * cin * ts * tsp        # pool matmul
               + 2 * n * cout * cin * hp * wp          # 1x1 conv
               + 3 * n * cin * h * w),                 # BN + ReLU
        transcendentals=0,
        bytes_accessed=(n * cin * h * w * 4 + ts * tsp * 2 + cout * cin * 2
                        + 2 * cin * 4 + n * cout * hp * wp * out_bytes))

    kernel = functools.partial(_transition_kernel, ew_dtype=ew_dtype)

    out_flat = pl.pallas_call(
        kernel,
        out_shape=jax.ShapeDtypeStruct((n, cout, hp * wp), out_dtype),
        grid=(n, n_bands),
        in_specs=[
            pl.BlockSpec((1, cin, ts), lambda b, t: (b, 0, t)),
            pl.BlockSpec((cin, 1), lambda b, t: (0, 0)),
            pl.BlockSpec((cin, 1), lambda b, t: (0, 0)),
            pl.BlockSpec((ts, tsp), lambda b, t: (0, 0)),
            pl.BlockSpec((cout, cin), lambda b, t: (0, 0)),
        ],
        out_specs=pl.BlockSpec((1, cout, tsp), lambda b, t: (b, 0, t)),
        compiler_params=pltpu.CompilerParams(
            dimension_semantics=("parallel", "parallel"),
            vmem_limit_bytes=vmem_limit),
        cost_estimate=cost,
    )(x_flat, scale_c, bias_c, pool_mat, wgt)

    # (N, Cout, Hp*Wp) is already NCHW up to a FREE reshape (no transpose).
    return out_flat.reshape(n, cout, hp, wp)


def transition_reference(x, gamma, beta, mean, var, conv_w, eps=1e-5):
    # Pure-JAX f32 reference mirroring the PyTorch forward (eval mode).
    xn = (x - mean[None, :, None, None]) / jnp.sqrt(var[None, :, None, None] + eps)
    y = jnp.maximum(xn * gamma[None, :, None, None] + beta[None, :, None, None], 0.0)
    w2 = conv_w.reshape(conv_w.shape[0], conv_w.shape[1])         # (Cout, Cin)
    z = jnp.einsum('nchw,oc->nohw', y, w2)
    N, C, H, W = z.shape
    return z.reshape(N, C, H // 2, 2, W // 2, 2).mean(axis=(3, 5))


if __name__ == "__main__":
    N, Cin, Cout, H, W = 2, 4, 2, 16, 16
    key = jax.random.PRNGKey(0)
    kx, kg, kb, km, kv, kw = jax.random.split(key, 6)

    x = jax.random.normal(kx, (N, Cin, H, W), jnp.float32)
    gamma = 1.0 + 0.1 * jax.random.normal(kg, (Cin,), jnp.float32)
    beta = 0.1 * jax.random.normal(kb, (Cin,), jnp.float32)
    run_mean = 0.1 * jax.random.normal(km, (Cin,), jnp.float32)
    run_var = jnp.abs(1.0 + 0.1 * jax.random.normal(kv, (Cin,), jnp.float32))
    conv_w = jax.random.normal(kw, (Cout, Cin, 1, 1), jnp.float32) * 0.5

    out = jax.block_until_ready(
        transition_forward(x, gamma, beta, run_mean, run_var, conv_w))
    assert out.shape == (N, Cout, H // 2, W // 2), out.shape

    # The kernel intentionally runs the matmuls (and the elementwise chain on
    # v6e/v7x) in bf16 and stores bf16, so compare against the f32 reference
    # with bf16-level tolerances.
    ref = transition_reference(x, gamma, beta, run_mean, run_var, conv_w)
    out_f32 = np.asarray(jnp.asarray(out, jnp.float32))
    np.testing.assert_allclose(out_f32, np.asarray(ref), atol=5e-2, rtol=5e-2)

    print("KERNEL_OK")
</pallas_src>

<mosaic_0001>
module attributes {stable_mosaic.version = 11 : i64} {
  func.func @_transition_kernel(%arg0: i32, %arg1: i32, %arg2: memref<1x4x256xf32, #tpu.memory_space<vmem>>, %arg3: memref<4x1xf32, #tpu.memory_space<vmem>>, %arg4: memref<4x1xf32, #tpu.memory_space<vmem>>, %arg5: memref<256x64xbf16, #tpu.memory_space<vmem>>, %arg6: memref<2x4xbf16, #tpu.memory_space<vmem>>, %arg7: memref<1x2x64xbf16, #tpu.memory_space<vmem>>) attributes {dimension_semantics = [#tpu.dimension_semantics<parallel>, #tpu.dimension_semantics<parallel>], iteration_bounds = array<i64: 2, 1>, scalar_prefetch = 0 : i64, scratch_operands = 0 : i64, tpu.core_type = #tpu.core_type<tc>, window_params = [{transform_indices = @transform_0, window_bounds = array<i64: 1, 4, 256>}, {pipeline_mode = #tpu.pipeline_mode<synchronous>, transform_indices = @transform_1, window_bounds = array<i64: 4, 1>}, {pipeline_mode = #tpu.pipeline_mode<synchronous>, transform_indices = @transform_2, window_bounds = array<i64: 4, 1>}, {pipeline_mode = #tpu.pipeline_mode<synchronous>, transform_indices = @transform_3, window_bounds = array<i64: 256, 64>}, {pipeline_mode = #tpu.pipeline_mode<synchronous>, transform_indices = @transform_4, window_bounds = array<i64: 2, 4>}, {transform_indices = @transform_5, window_bounds = array<i64: 1, 2, 64>}]} {
    %c0 = arith.constant 0 : index
    %c0_0 = arith.constant 0 : index
    %c0_1 = arith.constant 0 : index
    %0 = vector.load %arg2[%c0, %c0_0, %c0_1] : memref<1x4x256xf32, #tpu.memory_space<vmem>>, vector<1x4x256xf32>
    %1 = vector.shape_cast %0 : vector<1x4x256xf32> to vector<4x256xf32>
    %2 = arith.truncf %1 : vector<4x256xf32> to vector<4x256xbf16>
    %c0_2 = arith.constant 0 : index
    %c0_3 = arith.constant 0 : index
    %3 = vector.load %arg3[%c0_2, %c0_3] : memref<4x1xf32, #tpu.memory_space<vmem>>, vector<4x1xf32>
    %4 = arith.truncf %3 : vector<4x1xf32> to vector<4x1xbf16>
    %5 = vector.broadcast %4 : vector<4x1xbf16> to vector<4x256xbf16>
    %6 = arith.mulf %2, %5 : vector<4x256xbf16>
    %c0_4 = arith.constant 0 : index
    %c0_5 = arith.constant 0 : index
    %7 = vector.load %arg4[%c0_4, %c0_5] : memref<4x1xf32, #tpu.memory_space<vmem>>, vector<4x1xf32>
    %8 = arith.truncf %7 : vector<4x1xf32> to vector<4x1xbf16>
    %9 = vector.broadcast %8 : vector<4x1xbf16> to vector<4x256xbf16>
    %10 = arith.addf %6, %9 : vector<4x256xbf16>
    %cst = arith.constant 0.000000e+00 : bf16
    %11 = vector.broadcast %cst : bf16 to vector<4x256xbf16>
    %12 = arith.maximumf %10, %11 : vector<4x256xbf16>
    %c0_6 = arith.constant 0 : index
    %c0_7 = arith.constant 0 : index
    %13 = vector.load %arg5[%c0_6, %c0_7] : memref<256x64xbf16, #tpu.memory_space<vmem>>, vector<256x64xbf16>
    %cst_8 = arith.constant dense<0.000000e+00> : vector<4x64xf32>
    %14 = tpu.matmul %12, %13, %cst_8 {dimension_numbers = #tpu.dot_dimension_numbers<[1], [0], [0], [1], [0, 0, 1, 1], [], []>} : vector<4x256xbf16>, vector<256x64xbf16>, vector<4x64xf32> -> vector<4x64xf32>
    %c0_9 = arith.constant 0 : index
    %c0_10 = arith.constant 0 : index
    %15 = vector.load %arg6[%c0_9, %c0_10] : memref<2x4xbf16, #tpu.memory_space<vmem>>, vector<2x4xbf16>
    %16 = arith.truncf %14 : vector<4x64xf32> to vector<4x64xbf16>
    %cst_11 = arith.constant dense<0.000000e+00> : vector<2x64xf32>
    %17 = tpu.matmul %15, %16, %cst_11 {dimension_numbers = #tpu.dot_dimension_numbers<[1], [0], [0], [1], [0, 0, 1, 1], [], []>} : vector<2x4xbf16>, vector<4x64xbf16>, vector<2x64xf32> -> vector<2x64xf32>
    %18 = arith.truncf %17 : vector<2x64xf32> to vector<2x64xbf16>
    %c0_12 = arith.constant 0 : index
    %c0_13 = arith.constant 0 : index
    %c0_14 = arith.constant 0 : index
    %19 = vector.load %arg7[%c0_12, %c0_13, %c0_14] : memref<1x2x64xbf16, #tpu.memory_space<vmem>>, vector<1x2x64xbf16>
    %20 = vector.shape_cast %19 : vector<1x2x64xbf16> to vector<2x64xbf16>
    %21 = vector.shape_cast %18 : vector<2x64xbf16> to vector<1x2x64xbf16>
    tpu.vector_store %arg7[%c0_12, %c0_13, %c0_14], %21 {strides = array<i32>} : memref<1x2x64xbf16, #tpu.memory_space<vmem>>, vector<1x2x64xbf16>,
    return
  }
  func.func @transform_0(%arg0: i32, %arg1: i32) -> (i32, i32, i32) {
    %c0_i32 = arith.constant 0 : i32
    %c0_i32_0 = arith.constant 0 : i32
    return %arg0, %c0_i32, %arg1 : i32, i32, i32
  }
  func.func @transform_1(%arg0: i32, %arg1: i32) -> (i32, i32) {
    %c0_i32 = arith.constant 0 : i32
    %c0_i32_0 = arith.constant 0 : i32
    %c0_i32_1 = arith.constant 0 : i32
    return %c0_i32, %c0_i32_0 : i32, i32
  }
  func.func @transform_2(%arg0: i32, %arg1: i32) -> (i32, i32) {
    %c0_i32 = arith.constant 0 : i32
    %c0_i32_0 = arith.constant 0 : i32
    %c0_i32_1 = arith.constant 0 : i32
    return %c0_i32, %c0_i32_0 : i32, i32
  }
  func.func @transform_3(%arg0: i32, %arg1: i32) -> (i32, i32) {
    %c0_i32 = arith.constant 0 : i32
    %c0_i32_0 = arith.constant 0 : i32
    %c0_i32_1 = arith.constant 0 : i32
    return %c0_i32, %c0_i32_0 : i32, i32
  }
  func.func @transform_4(%arg0: i32, %arg1: i32) -> (i32, i32) {
    %c0_i32 = arith.constant 0 : i32
    %c0_i32_0 = arith.constant 0 : i32
    %c0_i32_1 = arith.constant 0 : i32
    return %c0_i32, %c0_i32_0 : i32, i32
  }
  func.func @transform_5(%arg0: i32, %arg1: i32) -> (i32, i32, i32) {
    %c0_i32 = arith.constant 0 : i32
    %c0_i32_0 = arith.constant 0 : i32
    return %arg0, %c0_i32, %arg1 : i32, i32, i32
  }
}

</mosaic_0001>

<bundles_post_ra>
// kernel: tpu_custom_call.1
= control target key start
LH: loop header
LB: loop body
LE: loop exit
PB: predicated region body
PF: predicated region fallthrough
CT: control target
= control target key end

     0   :  { %10 = vsyncpa [#allocation3], 0  ;;  %s1001_s0 = inlined_call_operand.vmem [shape: f32[2,4,256], index: 0, kind: input, shape index: {}]   ;;  %s1002_s1 = inlined_call_operand.vmem [shape: f32[4,1], index: 1, kind: input, shape index: {}]   ;;  %s1003_s2 = inlined_call_operand.vmem [shape: f32[4,1], index: 2, kind: input, shape index: {}]   ;;  %s1004_s3 = inlined_call_operand.vmem [shape: bf16[256,64], index: 3, kind: input, shape index: {}]   ;;  %s1005_s4 = inlined_call_operand.vmem [shape: bf16[2,4], index: 4, kind: input, shape index: {}]   ;;  %s1006_s5 = inlined_call_operand.hbm [shape: bf16[2,2,64], index: 5, kind: output, shape index: {}]  }
   0x1   :  { %12 = vsyncpa [#allocation3 + $0x1], 0  ;;  %s832_s18 = smov 0   ;;  %s834_s19 = smov 0  }
   0x2   :  { %s836_s20 = smov 0   ;;  %s838_s21 = smov 0  }
   0x3   :  { %s840_s22 = smov 0   ;;  %s842_s23 = smov 0  }
   0x4 LB: > { %s584_s24 = sadd.s32 4294967295, %s796_s23   ;;  %s585_s25 = sadd.s32 4294967294, %s796_s23   ;;  %s796_s23 = sphi %s842_s23, %s18_s23   ;;  %s792_s22 = sphi %s840_s22, %s1013_s22   ;;  %s788_s21 = sphi %s838_s21, %s1012_s21   ;;  %s784_s20 = sphi %s836_s20, %s1011_s20   ;;  %s780_s19 = sphi %s834_s19, %s1010_s19   ;;  %s776_s18 = sphi %s832_s18, %s1009_s18  }
   0x5   : > { %s30_s26 = sadd.s32 1, %s792_s22  ;;  %s151_s27 = sadd.s32 1, %s784_s20 }
   0x6   : > { %p32_p0 = scmp.ge.s32.totalorder %s30_s26, 2  ;;  %p161_p1 = scmp.ne.s32.totalorder %s784_s20, %s780_s19 }
   0x7   : > { %p162_p2 = scmp.eq.s32.totalorder %s584_s24, 1  ;;  %p167_p3 = scmp.ne.s32.totalorder %s780_s19, %s776_s18 }
   0x8   : > { %s1015_s26 = smov (%p32_p0, %s30_s26), 0  ;;  %p168_p5 = scmp.eq.s32.totalorder %s585_s25, 1 }
   0x9   : > { %p872_p4 = por %p162_p2, %p161_p1  ;;  %s146_s29 = ssub.s32 %s792_s22, %s1015_s26 }
   0xa   : > { %p588_p6 = scmp.ge.s32.totalorder %s796_s23, 1  ;;  %p149_p7 = scmp.eq.s32.totalorder %s146_s29, 0 }
   0xb   : > { %p879_p8 = por %p168_p5, %p167_p3  ;;  %p211_p9 = scmp.lt.s32.totalorder %s796_s23, 3 }
   0xc   : > { %s885_s6 = scalar_select %p149_p7, %s784_s20, %s151_s27  }
   0xd   : > { %p212_p10 = pnand %p588_p6, %p211_p9 }
   0xe   : > { %v259_v0 = vld [vmem:[%s1002_s1] sm:$0xf] (!%p212_p10)  ;;  %v798_v3 = vmov (!%p212_p10), 0   ;;  %v703_v7 = vld [vmem:[%s1004_s3 + $0x48] sm:$0xff] (!%p212_p10)   ;;  %v705_v9 = vld [vmem:[%s1004_s3 + $0x50] sm:$0xff] (!%p212_p10)   ;;  %p243_p11 = scmp.lt.s32.totalorder (!%p212_p10), %s788_s21, 1 }
   0xf   : > { %215 = sbr.rel (%p212_p10) target bundleno = 603 (0x25b), region = 40  ;;  %v268_v1 = vld [vmem:[%s1003_s2] sm:$0xf] (!%p212_p10)  ;;  %700 = vset.pattern.permute.xlu0 (!%p212_p10), %v798_v3  ;;  %v260_v4 = vpack.c.bf16 (!%p212_p10), %v259_v0, %v259_v0  ;;  %v704_v8 = vld [vmem:[%s1004_s3 + $0x8] sm:$0xff] (!%p212_p10)   ;;  %v706_v10 = vld [vmem:[%s1004_s3 + $0x10] sm:$0xff] (!%p212_p10)   ;;  %v799_v33 = vmov (!%p212_p10), 0.0  }
  0x10   : > { %v701_v2 = vld [vmem:[%s1004_s3 + $0x40] sm:$0xff] (!%p212_p10)   ;;  %v269_v6 = vpack.c.bf16 (!%p212_p10), %v268_v1, %v268_v1  ;;  %v707_v11 = vld [vmem:[%s1004_s3 + $0x58] sm:$0xff] (!%p212_p10)   ;;  %v711_v15 = vld [vmem:[%s1004_s3 + $0x68] sm:$0xff] (!%p212_p10)   ;;  %636 = vmatprep.subr.bf16.mxu1 (!%p212_p10), %v799_v33  ;;  %vm800_vm0 = vmmov (!%p212_p10), 0   ;;  %vm453_vm1 = vcmask (!%p212_p10), 1041408   ;;  %vm449_vm2 = vcmask (!%p212_p10), 31744  }
  0x11   : > { %612 = vmatprep.subr.bf16.mxu0 (!%p212_p10), %v701_v2  ;;  %v702_v5 = vld [vmem:[%s1004_s3] sm:$0xff] (!%p212_p10)   ;;  %263 = vperm.xlu0 (!%p212_p10), %700, %v260_v4   ;;  %v708_v12 = vld [vmem:[%s1004_s3 + $0x18] sm:$0xff] (!%p212_p10)   ;;  %v712_v16 = vld [vmem:[%s1004_s3 + $0x28] sm:$0xff] (!%p212_p10)   ;;  %s240_s27 = sand.u32 (!%p212_p10), 1, %s780_s19   ;;  %s608_s29 = sshll.u32 (!%p212_p10), %s788_s21, 4  ;;  %vm498_vm3 = vcmask (!%p212_p10), 516096  }
  0x12   : > { %613 = vmatpush3.bf16.msra.mxu0 (!%p212_p10), %v702_v5  ;;  %v709_v13 = vld [vmem:[%s1004_s3 + $0x60] sm:$0xff] (!%p212_p10)   ;;  %v714_v17 = vld [vmem:[%s1004_s3 + $0x70] sm:$0xff] (!%p212_p10)   ;;  %v716_v19 = vld [vmem:[%s1004_s3 + $0x78] sm:$0xff] (!%p212_p10)   ;;  %638 = vmatprep.mubr.msk.bf16.mxu1 (!%p212_p10), %vm800_vm0, %v799_v33  ;;  %s241_s7 = scalar_lea.vmem (!%p212_p10), [#allocation2], %s240_s27  ;;  %s954_s11 = scalar_lea.hbm (!%p212_p10), %s1006_s5, %s608_s29 }
  0x13   : > { %614 = vmatprep.subr.bf16.mxu0 (!%p212_p10), %v703_v7  ;;  %v710_v14 = vld [vmem:[%s1004_s3 + $0x20] sm:$0xff] (!%p212_p10)   ;;  %v715_v18 = vld [vmem:[%s1004_s3 + $0x30] sm:$0xff] (!%p212_p10)   ;;  %v717_v20 = vld [vmem:[%s1004_s3 + $0x38] sm:$0xff] (!%p212_p10)   ;;  %s514_s8 = sshll.u32 (!%p212_p10), %s241_s7, 4  ;;  %s956_s8 = int_to_ptr.vmem [resolvable:$true] %s514_s8 }
  0x14   : > { %v447_v41 = vld [vmem:[%s1005_s4] sm:$0x1] (!%p212_p10)  ;;  %s718_s12 = scalar_lea.vmem (!%p212_p10), %s956_s8, 16 }
  0x15   : > { %272 = vperm.xlu0 (!%p212_p10), %700, %v269_v6   ;;  %p719_p12 = scmp.ne.s32.totalorder (!%p212_p10), %s956_s8, %s718_s12 }
  0x16   : > { %615 = vmatpush3.bf16.msra.mxu0 %v704_v8  ;;  %s244_s13 = scalar_select %p243_p11, %s788_s21, 1 }
  0x17   : > { %616 = vmatprep.subr.bf16.mxu0 %v705_v9  ;;  %s501_s21 = scalar_lea.sflag [#allocation3], %s240_s27  ;;  %p720_p13 = pnand %p719_p12, %p872_p4 }
  0x18   : > { %s611_s14 = sshll.u32 %s244_s13, 3  ;;  %s801_s13 = smov [#allocation2]  }
  0x19   : > { %s250_s17 = scalar_lea.vmem %s1001_s0, %s611_s14  ;;  %p721_p0 = pneg %p720_p13 }
  0x1a   : > { %617 = vmatpush3.bf16.msra.mxu0 %v706_v10  ;;  %v253_v21 = vld [vmem:[%s250_s17] sm:$0xff]  ;;  %s722_s14 = sshll.u32 %s801_s13, 4  ;;  %s723_s14 = int_to_ptr.vmem [resolvable:$false] %s722_s14 }
  0x1b   : > { %618 = vmatprep.subr.bf16.mxu0 %v707_v11  ;;  %v255_v22 = vcombine.high %v253_v21, %v253_v21  ;;  %v257_v23 = vpack.c.bf16 %v253_v21, %v253_v21  ;;  %s724_s15 = scalar_lea.vmem %s723_s14, 32  ;;  %p725_p1 = scmp.lt.s32.totalorder %s956_s8, %s723_s14 }
  0x1c   : > { %p726_p2 = scmp.lt.s32.totalorder %s724_s15, %s718_s12 }
  0x1d   : > { %v258_v24 = vpack.c.bf16 %v255_v22, %v255_v22 }
  0x1e   : > { %619 = vmatpush3.bf16.msra.mxu0 %v708_v12  ;;  %p727_p3 = por %p726_p2, %p725_p1 }
  0x1f   : > { %620 = vmatprep.subr.bf16.mxu0 %v709_v13 }
  0x20   : > { %p728_p5 = pnand %p727_p3, %p721_p0 }
  0x22   : > { %621 = vmatpush3.bf16.msra.mxu0 %v710_v14 }
  0x23   : > { %622 = vmatprep.subr.bf16.mxu0 %v711_v15 }
  0x26   : > { %623 = vmatpush3.bf16.msra.mxu0 %v712_v16 }
  0x27   : > { %624 = vmatprep.subr.bf16.mxu0 %v714_v17 }
  0x2a   : > { %625 = vmatpush3.bf16.msra.mxu0 %v715_v18 }
  0x2b   : > { %626 = vmatprep.subr.bf16.mxu0 %v716_v19 }
  0x2e   : > { %627 = vmatpush3.bf16.msra.mxu0 %v717_v20 }
  0x90   : > { %v264_v25 = vpop.permute.xlu0 %263 }
  0x91   : > { %v266_v26 = vmul.bf16 %v264_v25, %v257_v23  ;;  %v267_v27 = vmul.bf16 %v264_v25, %v258_v24 }
  0x94   : > { %v273_v28 = vpop.permute.xlu0 %272 }
  0x95   : > { %v275_v29 = vadd.bf16 %v273_v28, %v266_v26  ;;  %v276_v30 = vadd.bf16 %v273_v28, %v267_v27 }
  0x97   : > { %v277_v31 = vmax.bf16 %v798_v3, %v275_v29  ;;  %v278_v32 = vmax.bf16 %v798_v3, %v276_v30 }
  0x99   : > { %439 = vmatprep.mubr.bf16.mxu0 %v278_v32 }
  0x9a   : > { %440 = vmatmul.mubr.bf16.vlgmr.msra.gmra.mrb[0].mxu0 %v277_v31 }
 0x16d   : > { %v628_v34 = vpop.f32.mrb[0].mxu0 }
 0x16e   : > { %v629_v35 = vpop.f32.mrb[1].mxu0 }
 0x16f   : > { %v630_v36 = vadd.f32 %v629_v35, %v628_v34  ;;  %v631_v37 = vpop.f32.mrb[2].mxu0 }
 0x170   : > { %v632_v38 = vpop.f32.mrb[3].mxu0 }
 0x171   : > { %v448_v39 = vpack.c.bf16 %v630_v36, %v630_v36 }
 0x173   : > { %v455_v40 = vsel %vm453_vm1, %v448_v39, 0 }
 0x174   : > { %637 = vmatpush3.bf16.msra.mxu1 %v455_v40 }
 0x177   : > { %639 = vmatmul.mubr.msk.bf16.vlgmr.msra.gmra.mrb[0].mxu1 %vm449_vm2, %v447_v41 }
 0x24a   : > { %v491_v42 = vpop.f32.mrb[0].mxu1 }
 0x24b   : > { %v497_v43 = vpack.c.bf16 %v491_v42, %v491_v42  ;;  %v640_v44 = vpop.f32.mrb[1].mxu1 }
 0x24c   : > { %v494_v45 = vpop.f32.mrb[2].mxu1 }
 0x24d   : > { %v641_v46 = vpop.f32.mrb[3].mxu1  ;;  %499 = vst.msk [vmem:[%s241_s7] sm:$0x1] %vm498_vm3, %v497_v43 }
 0x24e   : > { %731 = shalt.err (!%p728_p5)
}
 0x24f   : > { %s732_s16 = scalar_lea.hbm %s954_s11, 16  ;;  %s736_s25 = scalar_lea.hbm %s1006_s5, 32 }
 0x250   : > { %p733_p6 = scmp.ne.s32.totalorder %s954_s11, %s732_s16  ;;  %p737_p10 = scmp.lt.u32.totalorder %s954_s11, %s1006_s5 }
 0x251   : > { %p738_p11 = scmp.lt.u32.totalorder %s736_s25, %s732_s16  ;;  %p740_p13 = scmp.lt.u32.totalorder %s732_s16, %s954_s11 }
 0x252   : > { %p734_p7 = pnand %p733_p6, %p872_p4 }
 0x253   : > { %p739_p12 = por %p738_p11, %p737_p10 }
 0x254   : > { %p735_p9 = pneg %p734_p7 }
 0x255   : > { %p741_p0 = por %p740_p13, %p739_p12 }
 0x257   : > { %p742_p1 = pnand %p741_p0, %p735_p9 }
 0x259   : > { %745 = shalt.err (!%p742_p1)
}
 0x25a   : > { %642 = dma.vmem_to_hbm [thread:$0]  (%p872_p4), %s956_s8, 16, %s954_s11, %s501_s21  }
 0x25b PF: > { %p648_p2 = scmp.ge.s32.totalorder %s796_s23, 2  ;;  %s526_s7 = sand.u32 1, %s776_s18  }
 0x25c   : > { %s527_s9 = scalar_lea.sflag [#allocation3], %s526_s7 }
 0x25d   : > { %p645_p3 = pnand %p648_p2, %p879_p8 }
 0x25f   : > { %771 = dma.done.wait (!%p645_p3), %s527_s9, 16  }
 0x260   : > { %773 = vsyncadd (!%p645_p3), %s527_s9, 4294967280  ;;  %s18_s23 = sadd.s32 1, %s796_s23   ;;  %s1009_s18 = smov %s780_s19 }
 0x261   : > { %p15_p5 = scmp.ge.s32.totalorder %s18_s23, 4   ;;  %s1010_s19 = smov %s784_s20 }
 0x262   : > { %s1011_s20 = smov %s885_s6  ;;  %s1012_s21 = smov %s792_s22 }
 0x263   : > { %s1013_s22 = smov %s1015_s26  ;;  %17 = sbr.rel (!%p15_p5) target bundleno = 4 (0x4), region = 75 }
 0x26a   :  { %531 = vsyncpa [#allocation3], 1 }
 0x26b   :  { %533 = vsyncpa [#allocation3 + $0x1], 1 }

</bundles_post_ra>
